<compile_context>
chip_gen: v6e
topology: v6e:2x2x1
jax: 0.10.0
libtpu: 0.0.40
codegen_flags: <defaults>
</compile_context>

<pallas_src>
import functools

import numpy as np
import jax
import jax.numpy as jnp
from jax import lax
from jax.experimental import pallas as pl
from jax.experimental.pallas import tpu as pltpu

# Bias on padded classes. exp(z_pad - m) underflows to exactly 0 in f32 as long as real
# logits stay far above -1e9 (true for any sane discriminator), so logsumexp is unbiased.
_NEG_BIG = -1e9


# ---------------------------------------------------------------------------
# WarmStartGradientReverseLayer: forward identity, backward -coeff * grad.
# ---------------------------------------------------------------------------
def warm_start_coeff(iter_num, alpha=1.0, lo=0.0, hi=1.0, max_iters=1000.0):
    # iter_num must be a host-side Python number (it is a module attribute in the
    # PyTorch original), not a traced value.
    return float(2.0 * (hi - lo) / (1.0 + np.exp(-alpha * float(iter_num) / max_iters))
                 - (hi - lo) + lo)


@functools.partial(jax.custom_vjp, nondiff_argnums=(1,))
def warm_start_grl(x, coeff=1.0):
    return x                       # identity forward, no HBM copy


def _grl_fwd(x, coeff):
    return x, None


def _grl_bwd(coeff, _res, g):
    return (-coeff * g,)


warm_start_grl.defvjp(_grl_fwd, _grl_bwd)
# TODO(synk): the Pallas discriminator kernel below is forward-only; a full training
# path would also need a custom VJP through the fused MLP+CE pallas_call so that the
# warm-start coeff actually scales gradients reaching the feature extractor.


def _round_up(x, m):
    return ((x + m - 1) // m) * m


def _pad2(x, rows, cols, fill=0.0):
    pr, pc = rows - x.shape[0], cols - x.shape[1]
    if pr == 0 and pc == 0:
        return x
    return jnp.pad(x, ((0, pr), (0, pc)), constant_values=fill)


# ---------------------------------------------------------------------------
# Fused discriminator (Linear->ReLU->Linear) + softmax cross entropy, one batch
# tile per grid step, weights VMEM-resident, per-tile partial loss sums out.
# ---------------------------------------------------------------------------
def _make_kernel(tn, c_p, label, n_valid, n_pad):
    label, n_valid, n_pad = int(label), int(n_valid), int(n_pad)

    def kernel(f_ref, w1_ref, b1_ref, w2_ref, b2_ref, out_ref):
        # in-kernel bf16 cast (features arrive f32 straight from HBM: 4 B/elem read,
        # no wrapper-side cast/pad pass)
        x = f_ref[...].astype(jnp.bfloat16)
        # hidden layer: bf16 x bf16 -> f32 accumulate on the MXU, ReLU on the VPU
        h = jnp.dot(x, w1_ref[...], preferred_element_type=jnp.float32) + b1_ref[...]
        h = jnp.maximum(h, 0.0)
        # second matmul also bf16 on the MXU (f32 acc); padded classes carry -1e9 bias
        z = jnp.dot(h.astype(jnp.bfloat16), w2_ref[...],
                    preferred_element_type=jnp.float32) + b2_ref[...]        # [tn, c_p]
        m = jnp.max(z, axis=-1, keepdims=True)
        lse = m + jnp.log(jnp.sum(jnp.exp(z - m), axis=-1, keepdims=True))    # [tn, 1]
        # segment label is a compile-time constant for this call (source=1/target=0/unknown=2)
        cls = lax.broadcasted_iota(jnp.int32, (tn, c_p), 1)
        picked = jnp.sum(jnp.where(cls == label, z, 0.0), axis=-1, keepdims=True)
        per_row = lse - picked                                                # [tn, 1]
        if n_valid < n_pad:   # static: mask only exists when the batch was padded
            rows = pl.program_id(0) * tn + lax.broadcasted_iota(jnp.int32, (tn, 1), 0)
            per_row = jnp.where(rows < n_valid, per_row, 0.0)
        # full (8,128) lane/sublane-dense tile -> unmasked stores
        out_ref[...] = jnp.full((1, 8, 128), jnp.sum(per_row), jnp.float32)

    return kernel


def _segment_loss_sum(f, label, w1_p, b1_p, w2_p, b2_p, *, tn, d_p, h_p, c_p):
    """Sum_i [lse(d(f_i)) - d(f_i)[label]] over one domain segment via one pallas_call."""
    n, d = f.shape
    if f.dtype != jnp.float32:
        f = f.astype(jnp.float32)
    tn_eff = max(8, min(_round_up(tn, 8), _round_up(n, 8)))
    n_p = _round_up(n, tn_eff)
    if (n_p, d_p) != (n, d):
        # only materialized when shapes actually need padding; common case is zero-copy
        f = _pad2(f, n_p, d_p)
    num_tiles = n_p // tn_eff

    kernel = _make_kernel(tn_eff, c_p, label, n, n_p)
    const = lambda i: (0, 0)

    # rough VMEM budget: double-buffered feature tiles + double-buffered weights + temps
    vmem_need = (2 * tn_eff * d_p * 4 + 2 * d_p * h_p * 2 + 2 * 8 * h_p * 4
                 + 2 * h_p * c_p * 2 + 2 * 8 * c_p * 4 + 2 * 8 * 128 * 4
                 + tn_eff * (d_p * 2 + h_p * 6 + c_p * 4))
    vmem_limit = int(min(max(2 * vmem_need, 32 * 1024 * 1024), 48 * 1024 * 1024))

    partial = pl.pallas_call(
        kernel,
        out_shape=jax.ShapeDtypeStruct((num_tiles, 8, 128), jnp.float32),
        grid=(num_tiles,),
        in_specs=[
            pl.BlockSpec((tn_eff, d_p), lambda i: (i, 0)),   # features tiled over batch
            pl.BlockSpec((d_p, h_p), const),                 # weights stay VMEM-resident
            pl.BlockSpec((1, h_p), const),
            pl.BlockSpec((h_p, c_p), const),
            pl.BlockSpec((1, c_p), const),
        ],
        out_specs=pl.BlockSpec((1, 8, 128), lambda i: (i, 0, 0)),
        compiler_params=pltpu.CompilerParams(
            dimension_semantics=("parallel",),
            vmem_limit_bytes=vmem_limit),
    )(f, w1_p, b1_p, w2_p, b2_p)
    return jnp.sum(partial[:, 0, 0])


def triple_domain_adversarial_loss(f_s, f_t, f_u, w1, b1, w2, b2, *,
                                   iter_num=0, alpha=1.0, lo=0.0, hi=1.0,
                                   max_iters=1000.0, tn=512):
    # ---- WarmStartGradientReverseLayer (forward identity, coeff on the backward path) ----
    coeff = warm_start_coeff(iter_num, alpha, lo, hi, max_iters)
    f_s = warm_start_grl(f_s, coeff)
    f_t = warm_start_grl(f_t, coeff)
    f_u = warm_start_grl(f_u, coeff)

    d = f_s.shape[1]
    h_dim, c = w1.shape[1], w2.shape[1]
    d_p, h_p, c_p = _round_up(d, 128), _round_up(h_dim, 128), _round_up(c, 128)
    # TODO(synk): on v6e/v7x, rounding h_p/d_p up to 256 multiples would fully feed the
    # 2x256x256 MXU once the kernel becomes compute-bound; irrelevant while HBM-bound.

    # weight prep is tiny: bf16 for both MXU operands, f32 biases, -1e9 bias on pad classes
    w1_p = _pad2(w1.astype(jnp.bfloat16), d_p, h_p)
    b1_p = _pad2(b1.astype(jnp.float32), 1, h_p)
    w2_p = _pad2(w2.astype(jnp.bfloat16), h_p, c_p)
    b2_p = _pad2(b2.astype(jnp.float32), 1, c_p, fill=_NEG_BIG)

    seg = functools.partial(_segment_loss_sum, w1_p=w1_p, b1_p=b1_p, w2_p=w2_p, b2_p=b2_p,
                            tn=tn, d_p=d_p, h_p=h_p, c_p=c_p)
    # per-segment calls: no N x D concat intermediate; labels are compile-time constants
    # (source -> 1, target -> 0, unknown -> 2, as in the PyTorch module)
    total = seg(f_s, 1) + seg(f_t, 0) + seg(f_u, 2)
    n_total = f_s.shape[0] + f_t.shape[0] + f_u.shape[0]
    return total / n_total


if __name__ == "__main__":
    # Small deterministic setup: 64 samples per domain, D = H = 128, 3 domain classes.
    B, D, H, C = 64, 128, 128, 3
    key = jax.random.PRNGKey(0)
    k_fs, k_ft, k_fu, k_w1, k_b1, k_w2, k_b2 = jax.random.split(key, 7)

    f_s = jax.random.normal(k_fs, (B, D), jnp.float32)
    f_t = jax.random.normal(k_ft, (B, D), jnp.float32)
    f_u = jax.random.normal(k_fu, (B, D), jnp.float32)

    w1 = jax.random.normal(k_w1, (D, H), jnp.float32) * 0.1
    b1 = jax.random.normal(k_b1, (1, H), jnp.float32) * 0.1
    w2 = jax.random.normal(k_w2, (H, C), jnp.float32) * 0.1
    b2 = jax.random.normal(k_b2, (1, C), jnp.float32) * 0.1

    # tn=32 -> 2 tiles per segment so the "parallel" grid axis splits evenly across the
    # two v7x TensorCores (no-op on single-TC v5e/v6e).
    fn = jax.jit(functools.partial(triple_domain_adversarial_loss, tn=32, iter_num=100))
    loss = jax.block_until_ready(fn(f_s, f_t, f_u, w1, b1, w2, b2))

    # Pure-JAX reference (matching the bf16 precision of both MXU matmuls).
    f = jnp.concatenate([f_s, f_t, f_u], axis=0)
    h_ref = jnp.maximum(
        jnp.dot(f.astype(jnp.bfloat16), w1.astype(jnp.bfloat16),
                preferred_element_type=jnp.float32) + b1, 0.0)
    z_ref = jnp.dot(h_ref.astype(jnp.bfloat16), w2.astype(jnp.bfloat16),
                    preferred_element_type=jnp.float32) + b2
    label = jnp.concatenate([jnp.ones((B,), jnp.int32),
                             jnp.zeros((B,), jnp.int32),
                             jnp.full((B,), 2, jnp.int32)])
    ref = jnp.mean(jax.nn.logsumexp(z_ref, axis=-1) - z_ref[jnp.arange(3 * B), label])

    assert np.allclose(np.asarray(loss), np.asarray(ref), rtol=2e-3, atol=2e-3), (loss, ref)
    print("KERNEL_OK")
</pallas_src>

<mosaic_0001>
module attributes {stable_mosaic.version = 11 : i64} {
  func.func @kernel(%arg0: i32, %arg1: memref<32x128xf32, #tpu.memory_space<vmem>>, %arg2: memref<128x128xbf16, #tpu.memory_space<vmem>>, %arg3: memref<1x128xf32, #tpu.memory_space<vmem>>, %arg4: memref<128x128xbf16, #tpu.memory_space<vmem>>, %arg5: memref<1x128xf32, #tpu.memory_space<vmem>>, %arg6: memref<1x8x128xf32, #tpu.memory_space<vmem>>) attributes {dimension_semantics = [#tpu.dimension_semantics<parallel>], iteration_bounds = array<i64: 2>, scalar_prefetch = 0 : i64, scratch_operands = 0 : i64, tpu.core_type = #tpu.core_type<tc>, window_params = [{transform_indices = @transform_0, window_bounds = array<i64: 32, 128>}, {pipeline_mode = #tpu.pipeline_mode<synchronous>, transform_indices = @transform_1, window_bounds = array<i64: 128, 128>}, {pipeline_mode = #tpu.pipeline_mode<synchronous>, transform_indices = @transform_2, window_bounds = array<i64: 1, 128>}, {pipeline_mode = #tpu.pipeline_mode<synchronous>, transform_indices = @transform_3, window_bounds = array<i64: 128, 128>}, {pipeline_mode = #tpu.pipeline_mode<synchronous>, transform_indices = @transform_4, window_bounds = array<i64: 1, 128>}, {transform_indices = @transform_5, window_bounds = array<i64: 1, 8, 128>}]} {
    %c0 = arith.constant 0 : index
    %c0_0 = arith.constant 0 : index
    %0 = vector.load %arg1[%c0, %c0_0] : memref<32x128xf32, #tpu.memory_space<vmem>>, vector<32x128xf32>
    %1 = arith.truncf %0 : vector<32x128xf32> to vector<32x128xbf16>
    %c0_1 = arith.constant 0 : index
    %c0_2 = arith.constant 0 : index
    %2 = vector.load %arg2[%c0_1, %c0_2] : memref<128x128xbf16, #tpu.memory_space<vmem>>, vector<128x128xbf16>
    %cst = arith.constant dense<0.000000e+00> : vector<32x128xf32>
    %3 = tpu.matmul %1, %2, %cst {dimension_numbers = #tpu.dot_dimension_numbers<[1], [0], [0], [1], [0, 0, 1, 1], [], []>} : vector<32x128xbf16>, vector<128x128xbf16>, vector<32x128xf32> -> vector<32x128xf32>
    %c0_3 = arith.constant 0 : index
    %c0_4 = arith.constant 0 : index
    %4 = vector.load %arg3[%c0_3, %c0_4] : memref<1x128xf32, #tpu.memory_space<vmem>>, vector<1x128xf32>
    %5 = vector.broadcast %4 : vector<1x128xf32> to vector<32x128xf32>
    %6 = arith.addf %3, %5 : vector<32x128xf32>
    %cst_5 = arith.constant 0.000000e+00 : f32
    %7 = vector.broadcast %cst_5 : f32 to vector<32x128xf32>
    %8 = arith.maximumf %6, %7 : vector<32x128xf32>
    %9 = arith.truncf %8 : vector<32x128xf32> to vector<32x128xbf16>
    %c0_6 = arith.constant 0 : index
    %c0_7 = arith.constant 0 : index
    %10 = vector.load %arg4[%c0_6, %c0_7] : memref<128x128xbf16, #tpu.memory_space<vmem>>, vector<128x128xbf16>
    %cst_8 = arith.constant dense<0.000000e+00> : vector<32x128xf32>
    %11 = tpu.matmul %9, %10, %cst_8 {dimension_numbers = #tpu.dot_dimension_numbers<[1], [0], [0], [1], [0, 0, 1, 1], [], []>} : vector<32x128xbf16>, vector<128x128xbf16>, vector<32x128xf32> -> vector<32x128xf32>
    %c0_9 = arith.constant 0 : index
    %c0_10 = arith.constant 0 : index
    %12 = vector.load %arg5[%c0_9, %c0_10] : memref<1x128xf32, #tpu.memory_space<vmem>>, vector<1x128xf32>
    %13 = vector.broadcast %12 : vector<1x128xf32> to vector<32x128xf32>
    %14 = arith.addf %11, %13 : vector<32x128xf32>
    %cst_11 = arith.constant dense<0xFF800000> : vector<32xf32>
    %15 = vector.multi_reduction <maximumf>, %14, %cst_11 [1] : vector<32x128xf32> to vector<32xf32>
    %16 = vector.shape_cast %15 : vector<32xf32> to vector<32x1xf32>
    %17 = vector.broadcast %16 : vector<32x1xf32> to vector<32x128xf32>
    %18 = arith.subf %14, %17 : vector<32x128xf32>
    %19 = math.exp %18 : vector<32x128xf32>
    %cst_12 = arith.constant dense<0.000000e+00> : vector<32xf32>
    %20 = vector.multi_reduction <add>, %19, %cst_12 [1] : vector<32x128xf32> to vector<32xf32>
    %21 = vector.shape_cast %20 : vector<32xf32> to vector<32x1xf32>
    %22 = math.log %21 : vector<32x1xf32>
    %23 = arith.addf %16, %22 : vector<32x1xf32>
    %24 = tpu.iota {dimensions = array<i32: 1>} : vector<32x128xi32>
    %c2_i32 = arith.constant 2 : i32
    %25 = vector.broadcast %c2_i32 : i32 to vector<32x128xi32>
    %26 = arith.cmpi eq, %24, %25 : vector<32x128xi32>
    %cst_13 = arith.constant 0.000000e+00 : f32
    %27 = vector.broadcast %cst_13 : f32 to vector<32x128xf32>
    %28 = arith.select %26, %14, %27 : vector<32x128xi1>, vector<32x128xf32>
    %cst_14 = arith.constant dense<0.000000e+00> : vector<32xf32>
    %29 = vector.multi_reduction <add>, %28, %cst_14 [1] : vector<32x128xf32> to vector<32xf32>
    %30 = vector.shape_cast %29 : vector<32xf32> to vector<32x1xf32>
    %31 = arith.subf %23, %30 : vector<32x1xf32>
    %32 = vector.shape_cast %31 : vector<32x1xf32> to vector<1x32x1xf32>
    %cst_15 = arith.constant dense<0.000000e+00> : vector<1xf32>
    %33 = vector.multi_reduction <add>, %32, %cst_15 [1, 2] : vector<1x32x1xf32> to vector<1xf32>
    %34 = vector.shape_cast %33 : vector<1xf32> to vector<1x1x1xf32>
    %35 = vector.extract %34[0, 0, 0] : f32 from vector<1x1x1xf32>
    %36 = vector.broadcast %35 : f32 to vector<1x8x128xf32>
    %c0_16 = arith.constant 0 : index
    %c0_17 = arith.constant 0 : index
    %c0_18 = arith.constant 0 : index
    %37 = vector.load %arg6[%c0_16, %c0_17, %c0_18] : memref<1x8x128xf32, #tpu.memory_space<vmem>>, vector<1x8x128xf32>
    tpu.vector_store %arg6[%c0_16, %c0_17, %c0_18], %36 {strides = array<i32>} : memref<1x8x128xf32, #tpu.memory_space<vmem>>, vector<1x8x128xf32>,
    return
  }
  func.func @transform_0(%arg0: i32) -> (i32, i32) {
    %c0_i32 = arith.constant 0 : i32
    %c0_i32_0 = arith.constant 0 : i32
    return %arg0, %c0_i32 : i32, i32
  }
  func.func @transform_1(%arg0: i32) -> (i32, i32) {
    %c0_i32 = arith.constant 0 : i32
    %c0_i32_0 = arith.constant 0 : i32
    %c0_i32_1 = arith.constant 0 : i32
    return %c0_i32, %c0_i32_0 : i32, i32
  }
  func.func @transform_2(%arg0: i32) -> (i32, i32) {
    %c0_i32 = arith.constant 0 : i32
    %c0_i32_0 = arith.constant 0 : i32
    %c0_i32_1 = arith.constant 0 : i32
    return %c0_i32, %c0_i32_0 : i32, i32
  }
  func.func @transform_3(%arg0: i32) -> (i32, i32) {
    %c0_i32 = arith.constant 0 : i32
    %c0_i32_0 = arith.constant 0 : i32
    %c0_i32_1 = arith.constant 0 : i32
    return %c0_i32, %c0_i32_0 : i32, i32
  }
  func.func @transform_4(%arg0: i32) -> (i32, i32) {
    %c0_i32 = arith.constant 0 : i32
    %c0_i32_0 = arith.constant 0 : i32
    %c0_i32_1 = arith.constant 0 : i32
    return %c0_i32, %c0_i32_0 : i32, i32
  }
  func.func @transform_5(%arg0: i32) -> (i32, i32, i32) {
    %c0_i32 = arith.constant 0 : i32
    %c0_i32_0 = arith.constant 0 : i32
    %c0_i32_1 = arith.constant 0 : i32
    return %arg0, %c0_i32, %c0_i32_0 : i32, i32, i32
  }
}

module attributes {stable_mosaic.version = 11 : i64} {
  func.func @kernel(%arg0: i32, %arg1: memref<32x128xf32, #tpu.memory_space<vmem>>, %arg2: memref<128x128xbf16, #tpu.memory_space<vmem>>, %arg3: memref<1x128xf32, #tpu.memory_space<vmem>>, %arg4: memref<128x128xbf16, #tpu.memory_space<vmem>>, %arg5: memref<1x128xf32, #tpu.memory_space<vmem>>, %arg6: memref<1x8x128xf32, #tpu.memory_space<vmem>>) attributes {dimension_semantics = [#tpu.dimension_semantics<parallel>], iteration_bounds = array<i64: 2>, scalar_prefetch = 0 : i64, scratch_operands = 0 : i64, tpu.core_type = #tpu.core_type<tc>, window_params = [{transform_indices = @transform_0, window_bounds = array<i64: 32, 128>}, {pipeline_mode = #tpu.pipeline_mode<synchronous>, transform_indices = @transform_1, window_bounds = array<i64: 128, 128>}, {pipeline_mode = #tpu.pipeline_mode<synchronous>, transform_indices = @transform_2, window_bounds = array<i64: 1, 128>}, {pipeline_mode = #tpu.pipeline_mode<synchronous>, transform_indices = @transform_3, window_bounds = array<i64: 128, 128>}, {pipeline_mode = #tpu.pipeline_mode<synchronous>, transform_indices = @transform_4, window_bounds = array<i64: 1, 128>}, {transform_indices = @transform_5, window_bounds = array<i64: 1, 8, 128>}]} {
    %c0 = arith.constant 0 : index
    %c0_0 = arith.constant 0 : index
    %0 = vector.load %arg1[%c0, %c0_0] : memref<32x128xf32, #tpu.memory_space<vmem>>, vector<32x128xf32>
    %1 = arith.truncf %0 : vector<32x128xf32> to vector<32x128xbf16>
    %c0_1 = arith.constant 0 : index
    %c0_2 = arith.constant 0 : index
    %2 = vector.load %arg2[%c0_1, %c0_2] : memref<128x128xbf16, #tpu.memory_space<vmem>>, vector<128x128xbf16>
    %cst = arith.constant dense<0.000000e+00> : vector<32x128xf32>
    %3 = tpu.matmul %1, %2, %cst {dimension_numbers = #tpu.dot_dimension_numbers<[1], [0], [0], [1], [0, 0, 1, 1], [], []>} : vector<32x128xbf16>, vector<128x128xbf16>, vector<32x128xf32> -> vector<32x128xf32>
    %c0_3 = arith.constant 0 : index
    %c0_4 = arith.constant 0 : index
    %4 = vector.load %arg3[%c0_3, %c0_4] : memref<1x128xf32, #tpu.memory_space<vmem>>, vector<1x128xf32>
    %5 = vector.broadcast %4 : vector<1x128xf32> to vector<32x128xf32>
    %6 = arith.addf %3, %5 : vector<32x128xf32>
    %cst_5 = arith.constant 0.000000e+00 : f32
    %7 = vector.broadcast %cst_5 : f32 to vector<32x128xf32>
    %8 = arith.maximumf %6, %7 : vector<32x128xf32>
    %9 = arith.truncf %8 : vector<32x128xf32> to vector<32x128xbf16>
    %c0_6 = arith.constant 0 : index
    %c0_7 = arith.constant 0 : index
    %10 = vector.load %arg4[%c0_6, %c0_7] : memref<128x128xbf16, #tpu.memory_space<vmem>>, vector<128x128xbf16>
    %cst_8 = arith.constant dense<0.000000e+00> : vector<32x128xf32>
    %11 = tpu.matmul %9, %10, %cst_8 {dimension_numbers = #tpu.dot_dimension_numbers<[1], [0], [0], [1], [0, 0, 1, 1], [], []>} : vector<32x128xbf16>, vector<128x128xbf16>, vector<32x128xf32> -> vector<32x128xf32>
    %c0_9 = arith.constant 0 : index
    %c0_10 = arith.constant 0 : index
    %12 = vector.load %arg5[%c0_9, %c0_10] : memref<1x128xf32, #tpu.memory_space<vmem>>, vector<1x128xf32>
    %13 = vector.broadcast %12 : vector<1x128xf32> to vector<32x128xf32>
    %14 = arith.addf %11, %13 : vector<32x128xf32>
    %cst_11 = arith.constant dense<0xFF800000> : vector<32xf32>
    %15 = vector.multi_reduction <maximumf>, %14, %cst_11 [1] : vector<32x128xf32> to vector<32xf32>
    %16 = vector.shape_cast %15 : vector<32xf32> to vector<32x1xf32>
    %17 = vector.broadcast %16 : vector<32x1xf32> to vector<32x128xf32>
    %18 = arith.subf %14, %17 : vector<32x128xf32>
    %19 = math.exp %18 : vector<32x128xf32>
    %cst_12 = arith.constant dense<0.000000e+00> : vector<32xf32>
    %20 = vector.multi_reduction <add>, %19, %cst_12 [1] : vector<32x128xf32> to vector<32xf32>
    %21 = vector.shape_cast %20 : vector<32xf32> to vector<32x1xf32>
    %22 = math.log %21 : vector<32x1xf32>
    %23 = arith.addf %16, %22 : vector<32x1xf32>
    %24 = tpu.iota {dimensions = array<i32: 1>} : vector<32x128xi32>
    %c0_i32 = arith.constant 0 : i32
    %25 = vector.broadcast %c0_i32 : i32 to vector<32x128xi32>
    %26 = arith.cmpi eq, %24, %25 : vector<32x128xi32>
    %cst_13 = arith.constant 0.000000e+00 : f32
    %27 = vector.broadcast %cst_13 : f32 to vector<32x128xf32>
    %28 = arith.select %26, %14, %27 : vector<32x128xi1>, vector<32x128xf32>
    %cst_14 = arith.constant dense<0.000000e+00> : vector<32xf32>
    %29 = vector.multi_reduction <add>, %28, %cst_14 [1] : vector<32x128xf32> to vector<32xf32>
    %30 = vector.shape_cast %29 : vector<32xf32> to vector<32x1xf32>
    %31 = arith.subf %23, %30 : vector<32x1xf32>
    %32 = vector.shape_cast %31 : vector<32x1xf32> to vector<1x32x1xf32>
    %cst_15 = arith.constant dense<0.000000e+00> : vector<1xf32>
    %33 = vector.multi_reduction <add>, %32, %cst_15 [1, 2] : vector<1x32x1xf32> to vector<1xf32>
    %34 = vector.shape_cast %33 : vector<1xf32> to vector<1x1x1xf32>
    %35 = vector.extract %34[0, 0, 0] : f32 from vector<1x1x1xf32>
    %36 = vector.broadcast %35 : f32 to vector<1x8x128xf32>
    %c0_16 = arith.constant 0 : index
    %c0_17 = arith.constant 0 : index
    %c0_18 = arith.constant 0 : index
    %37 = vector.load %arg6[%c0_16, %c0_17, %c0_18] : memref<1x8x128xf32, #tpu.memory_space<vmem>>, vector<1x8x128xf32>
    tpu.vector_store %arg6[%c0_16, %c0_17, %c0_18], %36 {strides = array<i32>} : memref<1x8x128xf32, #tpu.memory_space<vmem>>, vector<1x8x128xf32>,
    return
  }
  func.func @transform_0(%arg0: i32) -> (i32, i32) {
    %c0_i32 = arith.constant 0 : i32
    %c0_i32_0 = arith.constant 0 : i32
    return %arg0, %c0_i32 : i32, i32
  }
  func.func @transform_1(%arg0: i32) -> (i32, i32) {
    %c0_i32 = arith.constant 0 : i32
    %c0_i32_0 = arith.constant 0 : i32
    %c0_i32_1 = arith.constant 0 : i32
    return %c0_i32, %c0_i32_0 : i32, i32
  }
  func.func @transform_2(%arg0: i32) -> (i32, i32) {
    %c0_i32 = arith.constant 0 : i32
    %c0_i32_0 = arith.constant 0 : i32
    %c0_i32_1 = arith.constant 0 : i32
    return %c0_i32, %c0_i32_0 : i32, i32
  }
  func.func @transform_3(%arg0: i32) -> (i32, i32) {
    %c0_i32 = arith.constant 0 : i32
    %c0_i32_0 = arith.constant 0 : i32
    %c0_i32_1 = arith.constant 0 : i32
    return %c0_i32, %c0_i32_0 : i32, i32
  }
  func.func @transform_4(%arg0: i32) -> (i32, i32) {
    %c0_i32 = arith.constant 0 : i32
    %c0_i32_0 = arith.constant 0 : i32
    %c0_i32_1 = arith.constant 0 : i32
    return %c0_i32, %c0_i32_0 : i32, i32
  }
  func.func @transform_5(%arg0: i32) -> (i32, i32, i32) {
    %c0_i32 = arith.constant 0 : i32
    %c0_i32_0 = arith.constant 0 : i32
    %c0_i32_1 = arith.constant 0 : i32
    return %arg0, %c0_i32, %c0_i32_0 : i32, i32, i32
  }
}

module attributes {stable_mosaic.version = 11 : i64} {
  func.func @kernel(%arg0: i32, %arg1: memref<32x128xf32, #tpu.memory_space<vmem>>, %arg2: memref<128x128xbf16, #tpu.memory_space<vmem>>, %arg3: memref<1x128xf32, #tpu.memory_space<vmem>>, %arg4: memref<128x128xbf16, #tpu.memory_space<vmem>>, %arg5: memref<1x128xf32, #tpu.memory_space<vmem>>, %arg6: memref<1x8x128xf32, #tpu.memory_space<vmem>>) attributes {dimension_semantics = [#tpu.dimension_semantics<parallel>], iteration_bounds = array<i64: 2>, scalar_prefetch = 0 : i64, scratch_operands = 0 : i64, tpu.core_type = #tpu.core_type<tc>, window_params = [{transform_indices = @transform_0, window_bounds = array<i64: 32, 128>}, {pipeline_mode = #tpu.pipeline_mode<synchronous>, transform_indices = @transform_1, window_bounds = array<i64: 128, 128>}, {pipeline_mode = #tpu.pipeline_mode<synchronous>, transform_indices = @transform_2, window_bounds = array<i64: 1, 128>}, {pipeline_mode = #tpu.pipeline_mode<synchronous>, transform_indices = @transform_3, window_bounds = array<i64: 128, 128>}, {pipeline_mode = #tpu.pipeline_mode<synchronous>, transform_indices = @transform_4, window_bounds = array<i64: 1, 128>}, {transform_indices = @transform_5, window_bounds = array<i64: 1, 8, 128>}]} {
    %c0 = arith.constant 0 : index
    %c0_0 = arith.constant 0 : index
    %0 = vector.load %arg1[%c0, %c0_0] : memref<32x128xf32, #tpu.memory_space<vmem>>, vector<32x128xf32>
    %1 = arith.truncf %0 : vector<32x128xf32> to vector<32x128xbf16>
    %c0_1 = arith.constant 0 : index
    %c0_2 = arith.constant 0 : index
    %2 = vector.load %arg2[%c0_1, %c0_2] : memref<128x128xbf16, #tpu.memory_space<vmem>>, vector<128x128xbf16>
    %cst = arith.constant dense<0.000000e+00> : vector<32x128xf32>
    %3 = tpu.matmul %1, %2, %cst {dimension_numbers = #tpu.dot_dimension_numbers<[1], [0], [0], [1], [0, 0, 1, 1], [], []>} : vector<32x128xbf16>, vector<128x128xbf16>, vector<32x128xf32> -> vector<32x128xf32>
    %c0_3 = arith.constant 0 : index
    %c0_4 = arith.constant 0 : index
    %4 = vector.load %arg3[%c0_3, %c0_4] : memref<1x128xf32, #tpu.memory_space<vmem>>, vector<1x128xf32>
    %5 = vector.broadcast %4 : vector<1x128xf32> to vector<32x128xf32>
    %6 = arith.addf %3, %5 : vector<32x128xf32>
    %cst_5 = arith.constant 0.000000e+00 : f32
    %7 = vector.broadcast %cst_5 : f32 to vector<32x128xf32>
    %8 = arith.maximumf %6, %7 : vector<32x128xf32>
    %9 = arith.truncf %8 : vector<32x128xf32> to vector<32x128xbf16>
    %c0_6 = arith.constant 0 : index
    %c0_7 = arith.constant 0 : index
    %10 = vector.load %arg4[%c0_6, %c0_7] : memref<128x128xbf16, #tpu.memory_space<vmem>>, vector<128x128xbf16>
    %cst_8 = arith.constant dense<0.000000e+00> : vector<32x128xf32>
    %11 = tpu.matmul %9, %10, %cst_8 {dimension_numbers = #tpu.dot_dimension_numbers<[1], [0], [0], [1], [0, 0, 1, 1], [], []>} : vector<32x128xbf16>, vector<128x128xbf16>, vector<32x128xf32> -> vector<32x128xf32>
    %c0_9 = arith.constant 0 : index
    %c0_10 = arith.constant 0 : index
    %12 = vector.load %arg5[%c0_9, %c0_10] : memref<1x128xf32, #tpu.memory_space<vmem>>, vector<1x128xf32>
    %13 = vector.broadcast %12 : vector<1x128xf32> to vector<32x128xf32>
    %14 = arith.addf %11, %13 : vector<32x128xf32>
    %cst_11 = arith.constant dense<0xFF800000> : vector<32xf32>
    %15 = vector.multi_reduction <maximumf>, %14, %cst_11 [1] : vector<32x128xf32> to vector<32xf32>
    %16 = vector.shape_cast %15 : vector<32xf32> to vector<32x1xf32>
    %17 = vector.broadcast %16 : vector<32x1xf32> to vector<32x128xf32>
    %18 = arith.subf %14, %17 : vector<32x128xf32>
    %19 = math.exp %18 : vector<32x128xf32>
    %cst_12 = arith.constant dense<0.000000e+00> : vector<32xf32>
    %20 = vector.multi_reduction <add>, %19, %cst_12 [1] : vector<32x128xf32> to vector<32xf32>
    %21 = vector.shape_cast %20 : vector<32xf32> to vector<32x1xf32>
    %22 = math.log %21 : vector<32x1xf32>
    %23 = arith.addf %16, %22 : vector<32x1xf32>
    %24 = tpu.iota {dimensions = array<i32: 1>} : vector<32x128xi32>
    %c1_i32 = arith.constant 1 : i32
    %25 = vector.broadcast %c1_i32 : i32 to vector<32x128xi32>
    %26 = arith.cmpi eq, %24, %25 : vector<32x128xi32>
    %cst_13 = arith.constant 0.000000e+00 : f32
    %27 = vector.broadcast %cst_13 : f32 to vector<32x128xf32>
    %28 = arith.select %26, %14, %27 : vector<32x128xi1>, vector<32x128xf32>
    %cst_14 = arith.constant dense<0.000000e+00> : vector<32xf32>
    %29 = vector.multi_reduction <add>, %28, %cst_14 [1] : vector<32x128xf32> to vector<32xf32>
    %30 = vector.shape_cast %29 : vector<32xf32> to vector<32x1xf32>
    %31 = arith.subf %23, %30 : vector<32x1xf32>
    %32 = vector.shape_cast %31 : vector<32x1xf32> to vector<1x32x1xf32>
    %cst_15 = arith.constant dense<0.000000e+00> : vector<1xf32>
    %33 = vector.multi_reduction <add>, %32, %cst_15 [1, 2] : vector<1x32x1xf32> to vector<1xf32>
    %34 = vector.shape_cast %33 : vector<1xf32> to vector<1x1x1xf32>
    %35 = vector.extract %34[0, 0, 0] : f32 from vector<1x1x1xf32>
    %36 = vector.broadcast %35 : f32 to vector<1x8x128xf32>
    %c0_16 = arith.constant 0 : index
    %c0_17 = arith.constant 0 : index
    %c0_18 = arith.constant 0 : index
    %37 = vector.load %arg6[%c0_16, %c0_17, %c0_18] : memref<1x8x128xf32, #tpu.memory_space<vmem>>, vector<1x8x128xf32>
    tpu.vector_store %arg6[%c0_16, %c0_17, %c0_18], %36 {strides = array<i32>} : memref<1x8x128xf32, #tpu.memory_space<vmem>>, vector<1x8x128xf32>,
    return
  }
  func.func @transform_0(%arg0: i32) -> (i32, i32) {
    %c0_i32 = arith.constant 0 : i32
    %c0_i32_0 = arith.constant 0 : i32
    return %arg0, %c0_i32 : i32, i32
  }
  func.func @transform_1(%arg0: i32) -> (i32, i32) {
    %c0_i32 = arith.constant 0 : i32
    %c0_i32_0 = arith.constant 0 : i32
    %c0_i32_1 = arith.constant 0 : i32
    return %c0_i32, %c0_i32_0 : i32, i32
  }
  func.func @transform_2(%arg0: i32) -> (i32, i32) {
    %c0_i32 = arith.constant 0 : i32
    %c0_i32_0 = arith.constant 0 : i32
    %c0_i32_1 = arith.constant 0 : i32
    return %c0_i32, %c0_i32_0 : i32, i32
  }
  func.func @transform_3(%arg0: i32) -> (i32, i32) {
    %c0_i32 = arith.constant 0 : i32
    %c0_i32_0 = arith.constant 0 : i32
    %c0_i32_1 = arith.constant 0 : i32
    return %c0_i32, %c0_i32_0 : i32, i32
  }
  func.func @transform_4(%arg0: i32) -> (i32, i32) {
    %c0_i32 = arith.constant 0 : i32
    %c0_i32_0 = arith.constant 0 : i32
    %c0_i32_1 = arith.constant 0 : i32
    return %c0_i32, %c0_i32_0 : i32, i32
  }
  func.func @transform_5(%arg0: i32) -> (i32, i32, i32) {
    %c0_i32 = arith.constant 0 : i32
    %c0_i32_0 = arith.constant 0 : i32
    %c0_i32_1 = arith.constant 0 : i32
    return %arg0, %c0_i32, %c0_i32_0 : i32, i32, i32
  }
}

</mosaic_0001>

<bundles_post_ra>
// kernel: triple_domain_adversarial_loss.4
= control target key start
LH: loop header
LB: loop body
LE: loop exit
PB: predicated region body
PF: predicated region fallthrough
CT: control target
= control target key end

     0   :  { %s777_s18 = smov 0   ;;  %s859_s0 = inlined_call_operand.vmem [shape: f32[64,128], index: 0, kind: input, shape index: {}]   ;;  %s860_s1 = inlined_call_operand.vmem [shape: bf16[128,128], index: 1, kind: input, shape index: {}]   ;;  %s861_s2 = inlined_call_operand.vmem [shape: f32[1,128], index: 2, kind: input, shape index: {}]   ;;  %s862_s3 = inlined_call_operand.vmem [shape: bf16[128,128], index: 3, kind: input, shape index: {}]   ;;  %s863_s4 = inlined_call_operand.vmem [shape: f32[1,128], index: 4, kind: input, shape index: {}]   ;;  %s864_s5 = inlined_call_operand.vmem [shape: f32[2,8,128], index: 5, kind: output, shape index: {}]  }
   0x1 LB: > { %s783_s19 = sadd.s32 4294967295, %s745_s18   ;;  %p613_p0 = scmp.ge.s32.totalorder %s745_s18, 1  ;;  %s745_s18 = sphi %s777_s18, %s15_s18  }
   0x2   : > { %p188_p1 = scmp.lt.s32.totalorder %s745_s18, 3 }
   0x4   : > { %p189_p2 = pnand %p613_p0, %p188_p1 }
   0x5   : > { %s614_s22 = sshll.u32 (!%p189_p2), %s783_s19, 2  ;;  %p221_p4 = scmp.lt.s32.totalorder (!%p189_p2), %s783_s19, 1 }
   0x6   : > { %192 = sbr.rel (%p189_p2) target bundleno = 974 (0x3ce), region = 40  ;;  %p216_p3 = scmp.lt.s32.totalorder (!%p189_p2), %s614_s22, 7 }
   0xb   : > { %v707_v0 = vld [vmem:[%s860_s1 + $0x38] sm:$0xff]   ;;  %v708_v1 = vld [vmem:[%s860_s1 + $0x30] sm:$0xff]   ;;  %s866_s22 = smov (!%p216_p3, %s614_s22), 7  ;;  %v709_v2 = vld [vmem:[%s860_s1 + $0x28] sm:$0xff]   ;;  %v518_v58 = vlaneseq  ;;  %vm537_vm1 = vcmask 7168   ;;  %s868_s19 = smov (!%p221_p4, %s783_s19), 1 }
   0xc   : > { %657 = vmatprep.subr.bf16.mxu0 %v707_v0  ;;  %s615_s27 = sshll.u32 %s866_s22, 3  ;;  %v710_v3 = vld [vmem:[%s860_s1 + $0x20] sm:$0xff]   ;;  %v715_v7 = vld [vmem:[%s862_s3 + $0x38] sm:$0xff]   ;;  %v716_v8 = vld [vmem:[%s862_s3 + $0x30] sm:$0xff]   ;;  %s616_s13 = sshll.u32 %s868_s19, 3 }
   0xd   : > { %658 = vmatpush3.bf16.msra.mxu0 %v707_v0  ;;  %s800_s30 = scalar_lea.vmem %s859_s0, %s615_s27  ;;  %v711_v9 = vld [vmem:[%s860_s1 + $0x18] sm:$0xff]   ;;  %677 = vmatprep.subr.bf16.mxu1 %v715_v7  ;;  %v717_v10 = vld [vmem:[%s862_s3 + $0x28] sm:$0xff]   ;;  %v712_v11 = vld [vmem:[%s860_s1 + $0x10] sm:$0xff]   ;;  %v519_v61 = vand.u32 127, %v518_v58  ;;  %s224_s16 = scalar_lea.vmem %s864_s5, %s616_s13 }
   0xe   : > { %659 = vmatprep.subr.bf16.mxu0 %v708_v1  ;;  %v226_v4 = vld [vmem:[%s800_s30] sm:$0xff]  ;;  %v227_v5 = vld [vmem:[%s800_s30 + $0x8] sm:$0xff]  ;;  %678 = vmatpush3.bf16.msra.mxu1 %v715_v7  ;;  %v719_v14 = vld [vmem:[%s862_s3 + $0x18] sm:$0xff]  }
   0xf   : > { %v230_v6 = vpack.c.bf16 %v227_v5, %v226_v4  ;;  %679 = vmatprep.subr.bf16.mxu1 %v716_v8  ;;  %v718_v12 = vld [vmem:[%s862_s3 + $0x20] sm:$0xff]   ;;  %v713_v13 = vld [vmem:[%s860_s1 + $0x8] sm:$0xff]   ;;  %v228_v16 = vld [vmem:[%s800_s30 + $0x10] sm:$0xff]  ;;  %vm520_vm0 = vcmp.eq.s32.totalorder %v519_v61, 0 }
  0x10   : > { %v714_v15 = vld [vmem:[%s860_s1] sm:$0xff]   ;;  %v229_v17 = vld [vmem:[%s800_s30 + $0x18] sm:$0xff]  ;;  %v720_v19 = vld [vmem:[%s862_s3 + $0x10] sm:$0xff]  }
  0x11   : > { %660 = vmatpush3.bf16.msra.mxu0 %v708_v1  ;;  %673 = vmatprep.mubr.bf16.mxu0 %v230_v6  ;;  %v231_v18 = vpack.c.bf16 %v229_v17, %v228_v16  ;;  %v721_v20 = vld [vmem:[%s862_s3 + $0x8] sm:$0xff]   ;;  %v722_v21 = vld [vmem:[%s862_s3] sm:$0xff]  }
  0x12   : > { %661 = vmatprep.subr.bf16.mxu0 %v709_v2  ;;  %680 = vmatpush3.bf16.msra.mxu1 %v716_v8  ;;  %v617_v24 = vld [vmem:[%s861_s2] ss:$0 sm:$0xff] }
  0x13   : > { %681 = vmatprep.subr.bf16.mxu1 %v717_v10  ;;  %v626_v37 = vld [vmem:[%s863_s4] ss:$0 sm:$0xff] }
  0x15   : > { %662 = vmatpush3.bf16.msra.mxu0 %v709_v2 }
  0x16   : > { %663 = vmatprep.subr.bf16.mxu0 %v710_v3  ;;  %682 = vmatpush3.bf16.msra.mxu1 %v717_v10 }
  0x17   : > { %683 = vmatprep.subr.bf16.mxu1 %v718_v12 }
  0x19   : > { %664 = vmatpush3.bf16.msra.mxu0 %v710_v3 }
  0x1a   : > { %665 = vmatprep.subr.bf16.mxu0 %v711_v9  ;;  %684 = vmatpush3.bf16.msra.mxu1 %v718_v12 }
  0x1b   : > { %685 = vmatprep.subr.bf16.mxu1 %v719_v14 }
  0x1d   : > { %666 = vmatpush3.bf16.msra.mxu0 %v711_v9 }
  0x1e   : > { %667 = vmatprep.subr.bf16.mxu0 %v712_v11  ;;  %686 = vmatpush3.bf16.msra.mxu1 %v719_v14 }
  0x1f   : > { %687 = vmatprep.subr.bf16.mxu1 %v720_v19 }
  0x21   : > { %668 = vmatpush3.bf16.msra.mxu0 %v712_v11 }
  0x22   : > { %669 = vmatprep.subr.bf16.mxu0 %v713_v13  ;;  %688 = vmatpush3.bf16.msra.mxu1 %v720_v19 }
  0x23   : > { %689 = vmatprep.subr.bf16.mxu1 %v721_v20 }
  0x25   : > { %670 = vmatpush3.bf16.msra.mxu0 %v713_v13 }
  0x26   : > { %671 = vmatprep.subr.bf16.mxu0 %v714_v15  ;;  %690 = vmatpush3.bf16.msra.mxu1 %v721_v20 }
  0x27   : > { %691 = vmatprep.subr.bf16.mxu1 %v722_v21 }
  0x29   : > { %672 = vmatpush3.bf16.msra.mxu0 %v714_v15 }
  0x2a   : > { %692 = vmatpush3.bf16.msra.mxu1 %v722_v21 }
  0x2c   : > { %674 = vmatmul.mubr.bf16.vlgmr.msra.gmra.mxu0 %v231_v18 }
  0xec   : > { %v675_v22 = vpop.f32.mrf.mxu0 }
  0xed   : > { %v346_v28 = vadd.f32 %v675_v22, %v617_v24 }
  0xee   : > { %v337_v23 = vpop.f32.mrf.mxu0 }
  0xef   : > { %v338_v26 = vadd.f32 %v617_v24, %v337_v23  ;;  %v354_v34 = vmax.f32 %v346_v28, 0.0 }
  0xf0   : > { %v676_v25 = vpop.f32.mrf.mxu0 }
  0xf1   : > { %v349_v27 = vadd.f32 %v676_v25, %v617_v24  ;;  %v352_v32 = vmax.f32 %v338_v26, 0.0 }
  0xf2   : > { %v340_v29 = vpop.f32.mrf.mxu0 }
  0xf3   : > { %v341_v30 = vadd.f32 %v617_v24, %v340_v29  ;;  %v355_v31 = vmax.f32 %v349_v27, 0.0 }
  0xf5   : > { %v353_v33 = vmax.f32 %v341_v30, 0.0  ;;  %v357_v36 = vpack.c.bf16 %v355_v31, %v354_v34 }
  0xf7   : > { %v356_v35 = vpack.c.bf16 %v353_v33, %v352_v32 }
  0xf9   : > { %693 = vmatprep.mubr.bf16.mxu1 %v356_v35 }
  0xfa   : > { %694 = vmatmul.mubr.bf16.vlgmr.msra.gmra.mxu1 %v357_v36 }
 0x1ba   : > { %v695_v38 = vpop.f32.mrf.mxu1 }
 0x1bb   : > { %v472_v39 = vadd.f32 %v695_v38, %v626_v37 }
 0x1bc   : > { %v463_v40 = vpop.f32.mrf.mxu1 }
 0x1bd   : > { %v464_v41 = vadd.f32 %v626_v37, %v463_v40  ;;  %482 = vmax.xlane.f32.xlu1 %v472_v39  ;;  %v523_v2 = vsel %vm520_vm0, %v472_v39, 0.0 }
 0x1be   : > { %v696_v42 = vpop.f32.mrf.mxu1 }
 0x1bf   : > { %v475_v43 = vadd.f32 %v696_v42, %v626_v37  ;;  %478 = vmax.xlane.f32.xlu0 %v464_v41  ;;  %v521_v0 = vsel %vm520_vm0, %v464_v41, 0.0 }
 0x1c0   : > { %v466_v44 = vpop.f32.mrf.mxu1 }
 0x1c1   : > { %v467_v45 = vadd.f32 %v626_v37, %v466_v44  ;;  %484 = vmax.xlane.f32.xlu1 %v475_v43  ;;  %v524_v3 = vsel %vm520_vm0, %v475_v43, 0.0 }
 0x1c3   : > { %480 = vmax.xlane.f32.xlu0 %v467_v45  ;;  %v522_v1 = vsel %vm520_vm0, %v467_v45, 0.0 }
 0x246   : > { %v483_v46 = vpop.xlane.xlu1 %482 }
 0x247   : > { %v488_v47 = vsub.f32 %v472_v39, %v483_v46 }
 0x248   : > { %v479_v48 = vpop.xlane.xlu0 %478 }
 0x249   : > { %v486_v49 = vsub.f32 %v464_v41, %v479_v48  ;;  %v494_v52 = vmul.f32 1.442695, %v488_v47 }
 0x24a   : > { %v485_v50 = vpop.xlane.xlu1 %484 }
 0x24b   : > { %v490_v51 = vmul.f32 1.442695, %v486_v49  ;;  %v489_v54 = vsub.f32 %v475_v43, %v485_v50 }
 0x24c   : > { %v481_v53 = vpop.xlane.xlu0 %480 }
 0x24d   : > { %723 = vpow2.f32 %v490_v51  ;;  %v487_v55 = vsub.f32 %v467_v45, %v481_v53  ;;  %v496_v57 = vmul.f32 1.442695, %v489_v54 }
 0x24e   : > { %725 = vpow2.f32 %v494_v52 }
 0x24f   : > { %v492_v56 = vmul.f32 1.442695, %v487_v55 }
 0x251   : > { %727 = vpow2.f32 %v492_v56 }
 0x252   : > { %729 = vpow2.f32 %v496_v57 }
 0x25a   : > { %v724_v59 = vpop.eup %723 }
 0x25b   : > { %498 = vadd.xlane.f32.xlu0 %v724_v59  ;;  %v726_v60 = vpop.eup %725 }
 0x25e   : > { %v728_v62 = vpop.eup %727 }
 0x25f   : > { %502 = vadd.xlane.f32.xlu0 %v726_v60  ;;  %500 = vadd.xlane.f32.xlu1 %v728_v62  ;;  %v730_v63 = vpop.eup %729 }
 0x263   : > { %504 = vadd.xlane.f32.xlu1 %v730_v63  ;;  %525 = vadd.xlane.f32.xlu0 %v521_v0 }
 0x267   : > { %527 = vadd.xlane.f32.xlu1 %v522_v1  ;;  %529 = vadd.xlane.f32.xlu0 %v523_v2 }
 0x26b   : > { %531 = vadd.xlane.f32.xlu1 %v524_v3 }
 0x2e4   : > { %v499_v4 = vpop.xlane.xlu0 %498 }
 0x2e5   : > { %731 = vlog2.f32 %v499_v4 }
 0x2e8   : > { %v501_v5 = vpop.xlane.xlu1 %500  ;;  %v503_v6 = vpop.xlane.xlu0 %502 }
 0x2e9   : > { %733 = vlog2.f32 %v501_v5 }
 0x2ea   : > { %735 = vlog2.f32 %v503_v6 }
 0x2ec   : > { %v505_v7 = vpop.xlane.xlu1 %504  ;;  %v526_v11 = vpop.xlane.xlu0 %525 }
 0x2ed   : > { %737 = vlog2.f32 %v505_v7 }
 0x2f0   : > { %v528_v16 = vpop.xlane.xlu1 %527  ;;  %v530_v23 = vpop.xlane.xlu0 %529 }
 0x2f2   : > { %v732_v8 = vpop.eup %731 }
 0x2f3   : > { %v507_v9 = vmul.f32 0.6931472, %v732_v8 }
 0x2f4   : > { %v532_v29 = vpop.xlane.xlu1 %531 }
 0x2f5   : > { %v514_v10 = vadd.f32 %v507_v9, %v479_v48 }
 0x2f6   : > { %v734_v12 = vpop.eup %733 }
 0x2f7   : > { %v736_v13 = vpop.eup %735  ;;  %v509_v14 = vmul.f32 0.6931472, %v734_v12  ;;  %v533_v17 = vsub.f32 %v514_v10, %v526_v11 }
 0x2f8   : > { %v511_v15 = vmul.f32 0.6931472, %v736_v13 }
 0x2f9   : > { %v515_v18 = vadd.f32 %v509_v14, %v481_v53  ;;  %v538_v25 = vsel %vm537_vm1, %v533_v17, 0.0 }
 0x2fa   : > { %v738_v19 = vpop.eup %737  ;;  %v516_v20 = vadd.f32 %v511_v15, %v483_v46 }
 0x2fb   : > { %v513_v21 = vmul.f32 0.6931472, %v738_v19  ;;  %v534_v22 = vsub.f32 %v515_v18, %v528_v16 }
 0x2fc   : > { %v535_v24 = vsub.f32 %v516_v20, %v530_v23 }
 0x2fd   : > { %v539_v26 = vsel %vm537_vm1, %v534_v22, 0.0  ;;  %v517_v27 = vadd.f32 %v513_v21, %v485_v50 }
 0x2fe   : > { %v540_v28 = vadd.f32 %v539_v26, %v538_v25  ;;  %v541_v30 = vsel %vm537_vm1, %v535_v24, 0.0 }
 0x2ff   : > { %v536_v31 = vsub.f32 %v517_v27, %v532_v29 }
 0x300   : > { %v542_v32 = vadd.f32 %v541_v30, %v540_v28 }
 0x301   : > { %v543_v33 = vsel %vm537_vm1, %v536_v31, 0.0 }
 0x302   : > { %v544_v34 = vadd.f32 %v543_v33, %v542_v32 }
 0x304   : > { %545 = vadd.xlane.f32.xlu0 %v544_v34 }
 0x38d   : > { %v546_v35 = vpop.xlane.xlu0 %545 }
 0x38e   : > { %v547_v36 = vrot.slane %v546_v35, 4 }
 0x390   : > { %v548_v37 = vadd.f32 %v547_v36, %v546_v35 }
 0x392   : > { %v549_v38 = vrot.slane %v548_v37, 2 }
 0x394   : > { %v550_v39 = vadd.f32 %v549_v38, %v548_v37 }
 0x396   : > { %v551_v40 = vrot.slane %v550_v39, 1 }
 0x398   : > { %v552_v41 = vadd.f32 %v551_v40, %v550_v39 }
 0x39a   : > { %697 = vpush %v552_v41 }
 0x3cb   : > { %s698_s17 = spop %697 }
 0x3cc   : > { %v554_v42 = vstv %s698_s17 }
 0x3cd   : > { %555 = vst [vmem:[%s224_s16] sm:$0xff] %v554_v42 }
 0x3ce PF: > { %s15_s18 = sadd.s32 1, %s745_s18  }
 0x3cf   : > { %p12_p5 = scmp.ge.s32.totalorder %s15_s18, 4  }
 0x3d1   :  { %14 = sbr.rel (!%p12_p5) target bundleno = 1 (0x1), region = 70 }

// kernel: triple_domain_adversarial_loss.5
= control target key start
LH: loop header
LB: loop body
LE: loop exit
PB: predicated region body
PF: predicated region fallthrough
CT: control target
= control target key end

     0   :  { %s777_s18 = smov 0   ;;  %s859_s0 = inlined_call_operand.vmem [shape: f32[64,128], index: 0, kind: input, shape index: {}]   ;;  %s860_s1 = inlined_call_operand.vmem [shape: bf16[128,128], index: 1, kind: input, shape index: {}]   ;;  %s861_s2 = inlined_call_operand.vmem [shape: f32[1,128], index: 2, kind: input, shape index: {}]   ;;  %s862_s3 = inlined_call_operand.vmem [shape: bf16[128,128], index: 3, kind: input, shape index: {}]   ;;  %s863_s4 = inlined_call_operand.vmem [shape: f32[1,128], index: 4, kind: input, shape index: {}]   ;;  %s864_s5 = inlined_call_operand.vmem [shape: f32[2,8,128], index: 5, kind: output, shape index: {}]  }
   0x1 LB: > { %s783_s19 = sadd.s32 4294967295, %s745_s18   ;;  %p613_p0 = scmp.ge.s32.totalorder %s745_s18, 1  ;;  %s745_s18 = sphi %s777_s18, %s15_s18  }
   0x2   : > { %p188_p1 = scmp.lt.s32.totalorder %s745_s18, 3 }
   0x4   : > { %p189_p2 = pnand %p613_p0, %p188_p1 }
   0x5   : > { %s614_s22 = sshll.u32 (!%p189_p2), %s783_s19, 2  ;;  %p221_p4 = scmp.lt.s32.totalorder (!%p189_p2), %s783_s19, 1 }
   0x6   : > { %192 = sbr.rel (%p189_p2) target bundleno = 974 (0x3ce), region = 40  ;;  %p216_p3 = scmp.lt.s32.totalorder (!%p189_p2), %s614_s22, 7 }
   0xb   : > { %v707_v0 = vld [vmem:[%s860_s1 + $0x38] sm:$0xff]   ;;  %v708_v1 = vld [vmem:[%s860_s1 + $0x30] sm:$0xff]   ;;  %s866_s22 = smov (!%p216_p3, %s614_s22), 7  ;;  %v709_v2 = vld [vmem:[%s860_s1 + $0x28] sm:$0xff]   ;;  %v518_v58 = vlaneseq  ;;  %vm537_vm1 = vcmask 7168   ;;  %s868_s19 = smov (!%p221_p4, %s783_s19), 1 }
   0xc   : > { %657 = vmatprep.subr.bf16.mxu0 %v707_v0  ;;  %s615_s27 = sshll.u32 %s866_s22, 3  ;;  %v710_v3 = vld [vmem:[%s860_s1 + $0x20] sm:$0xff]   ;;  %v715_v7 = vld [vmem:[%s862_s3 + $0x38] sm:$0xff]   ;;  %v716_v8 = vld [vmem:[%s862_s3 + $0x30] sm:$0xff]   ;;  %s616_s13 = sshll.u32 %s868_s19, 3 }
   0xd   : > { %658 = vmatpush3.bf16.msra.mxu0 %v707_v0  ;;  %s800_s30 = scalar_lea.vmem %s859_s0, %s615_s27  ;;  %v711_v9 = vld [vmem:[%s860_s1 + $0x18] sm:$0xff]   ;;  %677 = vmatprep.subr.bf16.mxu1 %v715_v7  ;;  %v717_v10 = vld [vmem:[%s862_s3 + $0x28] sm:$0xff]   ;;  %v712_v11 = vld [vmem:[%s860_s1 + $0x10] sm:$0xff]   ;;  %v519_v61 = vand.u32 127, %v518_v58  ;;  %s224_s16 = scalar_lea.vmem %s864_s5, %s616_s13 }
   0xe   : > { %659 = vmatprep.subr.bf16.mxu0 %v708_v1  ;;  %v226_v4 = vld [vmem:[%s800_s30] sm:$0xff]  ;;  %v227_v5 = vld [vmem:[%s800_s30 + $0x8] sm:$0xff]  ;;  %678 = vmatpush3.bf16.msra.mxu1 %v715_v7  ;;  %v719_v14 = vld [vmem:[%s862_s3 + $0x18] sm:$0xff]  }
   0xf   : > { %v230_v6 = vpack.c.bf16 %v227_v5, %v226_v4  ;;  %679 = vmatprep.subr.bf16.mxu1 %v716_v8  ;;  %v718_v12 = vld [vmem:[%s862_s3 + $0x20] sm:$0xff]   ;;  %v713_v13 = vld [vmem:[%s860_s1 + $0x8] sm:$0xff]   ;;  %v228_v16 = vld [vmem:[%s800_s30 + $0x10] sm:$0xff]  ;;  %vm520_vm0 = vcmp.eq.s32.totalorder %v519_v61, 2 }
  0x10   : > { %v714_v15 = vld [vmem:[%s860_s1] sm:$0xff]   ;;  %v229_v17 = vld [vmem:[%s800_s30 + $0x18] sm:$0xff]  ;;  %v720_v19 = vld [vmem:[%s862_s3 + $0x10] sm:$0xff]  }
  0x11   : > { %660 = vmatpush3.bf16.msra.mxu0 %v708_v1  ;;  %673 = vmatprep.mubr.bf16.mxu0 %v230_v6  ;;  %v231_v18 = vpack.c.bf16 %v229_v17, %v228_v16  ;;  %v721_v20 = vld [vmem:[%s862_s3 + $0x8] sm:$0xff]   ;;  %v722_v21 = vld [vmem:[%s862_s3] sm:$0xff]  }
  0x12   : > { %661 = vmatprep.subr.bf16.mxu0 %v709_v2  ;;  %680 = vmatpush3.bf16.msra.mxu1 %v716_v8  ;;  %v617_v24 = vld [vmem:[%s861_s2] ss:$0 sm:$0xff] }
  0x13   : > { %681 = vmatprep.subr.bf16.mxu1 %v717_v10  ;;  %v626_v37 = vld [vmem:[%s863_s4] ss:$0 sm:$0xff] }
  0x15   : > { %662 = vmatpush3.bf16.msra.mxu0 %v709_v2 }
  0x16   : > { %663 = vmatprep.subr.bf16.mxu0 %v710_v3  ;;  %682 = vmatpush3.bf16.msra.mxu1 %v717_v10 }
  0x17   : > { %683 = vmatprep.subr.bf16.mxu1 %v718_v12 }
  0x19   : > { %664 = vmatpush3.bf16.msra.mxu0 %v710_v3 }
  0x1a   : > { %665 = vmatprep.subr.bf16.mxu0 %v711_v9  ;;  %684 = vmatpush3.bf16.msra.mxu1 %v718_v12 }
  0x1b   : > { %685 = vmatprep.subr.bf16.mxu1 %v719_v14 }
  0x1d   : > { %666 = vmatpush3.bf16.msra.mxu0 %v711_v9 }
  0x1e   : > { %667 = vmatprep.subr.bf16.mxu0 %v712_v11  ;;  %686 = vmatpush3.bf16.msra.mxu1 %v719_v14 }
  0x1f   : > { %687 = vmatprep.subr.bf16.mxu1 %v720_v19 }
  0x21   : > { %668 = vmatpush3.bf16.msra.mxu0 %v712_v11 }
  0x22   : > { %669 = vmatprep.subr.bf16.mxu0 %v713_v13  ;;  %688 = vmatpush3.bf16.msra.mxu1 %v720_v19 }
  0x23   : > { %689 = vmatprep.subr.bf16.mxu1 %v721_v20 }
  0x25   : > { %670 = vmatpush3.bf16.msra.mxu0 %v713_v13 }
  0x26   : > { %671 = vmatprep.subr.bf16.mxu0 %v714_v15  ;;  %690 = vmatpush3.bf16.msra.mxu1 %v721_v20 }
  0x27   : > { %691 = vmatprep.subr.bf16.mxu1 %v722_v21 }
  0x29   : > { %672 = vmatpush3.bf16.msra.mxu0 %v714_v15 }
  0x2a   : > { %692 = vmatpush3.bf16.msra.mxu1 %v722_v21 }
  0x2c   : > { %674 = vmatmul.mubr.bf16.vlgmr.msra.gmra.mxu0 %v231_v18 }
  0xec   : > { %v675_v22 = vpop.f32.mrf.mxu0 }
  0xed   : > { %v346_v28 = vadd.f32 %v675_v22, %v617_v24 }
  0xee   : > { %v337_v23 = vpop.f32.mrf.mxu0 }
  0xef   : > { %v338_v26 = vadd.f32 %v617_v24, %v337_v23  ;;  %v354_v34 = vmax.f32 %v346_v28, 0.0 }
  0xf0   : > { %v676_v25 = vpop.f32.mrf.mxu0 }
  0xf1   : > { %v349_v27 = vadd.f32 %v676_v25, %v617_v24  ;;  %v352_v32 = vmax.f32 %v338_v26, 0.0 }
  0xf2   : > { %v340_v29 = vpop.f32.mrf.mxu0 }
  0xf3   : > { %v341_v30 = vadd.f32 %v617_v24, %v340_v29  ;;  %v355_v31 = vmax.f32 %v349_v27, 0.0 }
  0xf5   : > { %v353_v33 = vmax.f32 %v341_v30, 0.0  ;;  %v357_v36 = vpack.c.bf16 %v355_v31, %v354_v34 }
  0xf7   : > { %v356_v35 = vpack.c.bf16 %v353_v33, %v352_v32 }
  0xf9   : > { %693 = vmatprep.mubr.bf16.mxu1 %v356_v35 }
  0xfa   : > { %694 = vmatmul.mubr.bf16.vlgmr.msra.gmra.mxu1 %v357_v36 }
 0x1ba   : > { %v695_v38 = vpop.f32.mrf.mxu1 }
 0x1bb   : > { %v472_v39 = vadd.f32 %v695_v38, %v626_v37 }
 0x1bc   : > { %v463_v40 = vpop.f32.mrf.mxu1 }
 0x1bd   : > { %v464_v41 = vadd.f32 %v626_v37, %v463_v40  ;;  %482 = vmax.xlane.f32.xlu1 %v472_v39  ;;  %v523_v2 = vsel %vm520_vm0, %v472_v39, 0.0 }
 0x1be   : > { %v696_v42 = vpop.f32.mrf.mxu1 }
 0x1bf   : > { %v475_v43 = vadd.f32 %v696_v42, %v626_v37  ;;  %478 = vmax.xlane.f32.xlu0 %v464_v41  ;;  %v521_v0 = vsel %vm520_vm0, %v464_v41, 0.0 }
 0x1c0   : > { %v466_v44 = vpop.f32.mrf.mxu1 }
 0x1c1   : > { %v467_v45 = vadd.f32 %v626_v37, %v466_v44  ;;  %484 = vmax.xlane.f32.xlu1 %v475_v43  ;;  %v524_v3 = vsel %vm520_vm0, %v475_v43, 0.0 }
 0x1c3   : > { %480 = vmax.xlane.f32.xlu0 %v467_v45  ;;  %v522_v1 = vsel %vm520_vm0, %v467_v45, 0.0 }
 0x246   : > { %v483_v46 = vpop.xlane.xlu1 %482 }
 0x247   : > { %v488_v47 = vsub.f32 %v472_v39, %v483_v46 }
 0x248   : > { %v479_v48 = vpop.xlane.xlu0 %478 }
 0x249   : > { %v486_v49 = vsub.f32 %v464_v41, %v479_v48  ;;  %v494_v52 = vmul.f32 1.442695, %v488_v47 }
 0x24a   : > { %v485_v50 = vpop.xlane.xlu1 %484 }
 0x24b   : > { %v490_v51 = vmul.f32 1.442695, %v486_v49  ;;  %v489_v54 = vsub.f32 %v475_v43, %v485_v50 }
 0x24c   : > { %v481_v53 = vpop.xlane.xlu0 %480 }
 0x24d   : > { %723 = vpow2.f32 %v490_v51  ;;  %v487_v55 = vsub.f32 %v467_v45, %v481_v53  ;;  %v496_v57 = vmul.f32 1.442695, %v489_v54 }
 0x24e   : > { %725 = vpow2.f32 %v494_v52 }
 0x24f   : > { %v492_v56 = vmul.f32 1.442695, %v487_v55 }
 0x251   : > { %727 = vpow2.f32 %v492_v56 }
 0x252   : > { %729 = vpow2.f32 %v496_v57 }
 0x25a   : > { %v724_v59 = vpop.eup %723 }
 0x25b   : > { %498 = vadd.xlane.f32.xlu0 %v724_v59  ;;  %v726_v60 = vpop.eup %725 }
 0x25e   : > { %v728_v62 = vpop.eup %727 }
 0x25f   : > { %502 = vadd.xlane.f32.xlu0 %v726_v60  ;;  %500 = vadd.xlane.f32.xlu1 %v728_v62  ;;  %v730_v63 = vpop.eup %729 }
 0x263   : > { %504 = vadd.xlane.f32.xlu1 %v730_v63  ;;  %525 = vadd.xlane.f32.xlu0 %v521_v0 }
 0x267   : > { %527 = vadd.xlane.f32.xlu1 %v522_v1  ;;  %529 = vadd.xlane.f32.xlu0 %v523_v2 }
 0x26b   : > { %531 = vadd.xlane.f32.xlu1 %v524_v3 }
 0x2e4   : > { %v499_v4 = vpop.xlane.xlu0 %498 }
 0x2e5   : > { %731 = vlog2.f32 %v499_v4 }
 0x2e8   : > { %v501_v5 = vpop.xlane.xlu1 %500  ;;  %v503_v6 = vpop.xlane.xlu0 %502 }
 0x2e9   : > { %733 = vlog2.f32 %v501_v5 }
 0x2ea   : > { %735 = vlog2.f32 %v503_v6 }
 0x2ec   : > { %v505_v7 = vpop.xlane.xlu1 %504  ;;  %v526_v11 = vpop.xlane.xlu0 %525 }
 0x2ed   : > { %737 = vlog2.f32 %v505_v7 }
 0x2f0   : > { %v528_v16 = vpop.xlane.xlu1 %527  ;;  %v530_v23 = vpop.xlane.xlu0 %529 }
 0x2f2   : > { %v732_v8 = vpop.eup %731 }
 0x2f3   : > { %v507_v9 = vmul.f32 0.6931472, %v732_v8 }
 0x2f4   : > { %v532_v29 = vpop.xlane.xlu1 %531 }
 0x2f5   : > { %v514_v10 = vadd.f32 %v507_v9, %v479_v48 }
 0x2f6   : > { %v734_v12 = vpop.eup %733 }
 0x2f7   : > { %v736_v13 = vpop.eup %735  ;;  %v509_v14 = vmul.f32 0.6931472, %v734_v12  ;;  %v533_v17 = vsub.f32 %v514_v10, %v526_v11 }
 0x2f8   : > { %v511_v15 = vmul.f32 0.6931472, %v736_v13 }
 0x2f9   : > { %v515_v18 = vadd.f32 %v509_v14, %v481_v53  ;;  %v538_v25 = vsel %vm537_vm1, %v533_v17, 0.0 }
 0x2fa   : > { %v738_v19 = vpop.eup %737  ;;  %v516_v20 = vadd.f32 %v511_v15, %v483_v46 }
 0x2fb   : > { %v513_v21 = vmul.f32 0.6931472, %v738_v19  ;;  %v534_v22 = vsub.f32 %v515_v18, %v528_v16 }
 0x2fc   : > { %v535_v24 = vsub.f32 %v516_v20, %v530_v23 }
 0x2fd   : > { %v539_v26 = vsel %vm537_vm1, %v534_v22, 0.0  ;;  %v517_v27 = vadd.f32 %v513_v21, %v485_v50 }
 0x2fe   : > { %v540_v28 = vadd.f32 %v539_v26, %v538_v25  ;;  %v541_v30 = vsel %vm537_vm1, %v535_v24, 0.0 }
 0x2ff   : > { %v536_v31 = vsub.f32 %v517_v27, %v532_v29 }
 0x300   : > { %v542_v32 = vadd.f32 %v541_v30, %v540_v28 }
 0x301   : > { %v543_v33 = vsel %vm537_vm1, %v536_v31, 0.0 }
 0x302   : > { %v544_v34 = vadd.f32 %v543_v33, %v542_v32 }
 0x304   : > { %545 = vadd.xlane.f32.xlu0 %v544_v34 }
 0x38d   : > { %v546_v35 = vpop.xlane.xlu0 %545 }
 0x38e   : > { %v547_v36 = vrot.slane %v546_v35, 4 }
 0x390   : > { %v548_v37 = vadd.f32 %v547_v36, %v546_v35 }
 0x392   : > { %v549_v38 = vrot.slane %v548_v37, 2 }
 0x394   : > { %v550_v39 = vadd.f32 %v549_v38, %v548_v37 }
 0x396   : > { %v551_v40 = vrot.slane %v550_v39, 1 }
 0x398   : > { %v552_v41 = vadd.f32 %v551_v40, %v550_v39 }
 0x39a   : > { %697 = vpush %v552_v41 }
 0x3cb   : > { %s698_s17 = spop %697 }
 0x3cc   : > { %v554_v42 = vstv %s698_s17 }
 0x3cd   : > { %555 = vst [vmem:[%s224_s16] sm:$0xff] %v554_v42 }
 0x3ce PF: > { %s15_s18 = sadd.s32 1, %s745_s18  }
 0x3cf   : > { %p12_p5 = scmp.ge.s32.totalorder %s15_s18, 4  }
 0x3d1   :  { %14 = sbr.rel (!%p12_p5) target bundleno = 1 (0x1), region = 70 }

// kernel: triple_domain_adversarial_loss.3
= control target key start
LH: loop header
LB: loop body
LE: loop exit
PB: predicated region body
PF: predicated region fallthrough
CT: control target
= control target key end

     0   :  { %s777_s18 = smov 0   ;;  %s859_s0 = inlined_call_operand.vmem [shape: f32[64,128], index: 0, kind: input, shape index: {}]   ;;  %s860_s1 = inlined_call_operand.vmem [shape: bf16[128,128], index: 1, kind: input, shape index: {}]   ;;  %s861_s2 = inlined_call_operand.vmem [shape: f32[1,128], index: 2, kind: input, shape index: {}]   ;;  %s862_s3 = inlined_call_operand.vmem [shape: bf16[128,128], index: 3, kind: input, shape index: {}]   ;;  %s863_s4 = inlined_call_operand.vmem [shape: f32[1,128], index: 4, kind: input, shape index: {}]   ;;  %s864_s5 = inlined_call_operand.vmem [shape: f32[2,8,128], index: 5, kind: output, shape index: {}]  }
   0x1 LB: > { %s783_s19 = sadd.s32 4294967295, %s745_s18   ;;  %p613_p0 = scmp.ge.s32.totalorder %s745_s18, 1  ;;  %s745_s18 = sphi %s777_s18, %s15_s18  }
   0x2   : > { %p188_p1 = scmp.lt.s32.totalorder %s745_s18, 3 }
   0x4   : > { %p189_p2 = pnand %p613_p0, %p188_p1 }
   0x5   : > { %s614_s22 = sshll.u32 (!%p189_p2), %s783_s19, 2  ;;  %p221_p4 = scmp.lt.s32.totalorder (!%p189_p2), %s783_s19, 1 }
   0x6   : > { %192 = sbr.rel (%p189_p2) target bundleno = 974 (0x3ce), region = 40  ;;  %p216_p3 = scmp.lt.s32.totalorder (!%p189_p2), %s614_s22, 7 }
   0xb   : > { %v707_v0 = vld [vmem:[%s860_s1 + $0x38] sm:$0xff]   ;;  %v708_v1 = vld [vmem:[%s860_s1 + $0x30] sm:$0xff]   ;;  %s866_s22 = smov (!%p216_p3, %s614_s22), 7  ;;  %v709_v2 = vld [vmem:[%s860_s1 + $0x28] sm:$0xff]   ;;  %v518_v58 = vlaneseq  ;;  %vm537_vm1 = vcmask 7168   ;;  %s868_s19 = smov (!%p221_p4, %s783_s19), 1 }
   0xc   : > { %657 = vmatprep.subr.bf16.mxu0 %v707_v0  ;;  %s615_s27 = sshll.u32 %s866_s22, 3  ;;  %v710_v3 = vld [vmem:[%s860_s1 + $0x20] sm:$0xff]   ;;  %v715_v7 = vld [vmem:[%s862_s3 + $0x38] sm:$0xff]   ;;  %v716_v8 = vld [vmem:[%s862_s3 + $0x30] sm:$0xff]   ;;  %s616_s13 = sshll.u32 %s868_s19, 3 }
   0xd   : > { %658 = vmatpush3.bf16.msra.mxu0 %v707_v0  ;;  %s800_s30 = scalar_lea.vmem %s859_s0, %s615_s27  ;;  %v711_v9 = vld [vmem:[%s860_s1 + $0x18] sm:$0xff]   ;;  %677 = vmatprep.subr.bf16.mxu1 %v715_v7  ;;  %v717_v10 = vld [vmem:[%s862_s3 + $0x28] sm:$0xff]   ;;  %v712_v11 = vld [vmem:[%s860_s1 + $0x10] sm:$0xff]   ;;  %v519_v61 = vand.u32 127, %v518_v58  ;;  %s224_s16 = scalar_lea.vmem %s864_s5, %s616_s13 }
   0xe   : > { %659 = vmatprep.subr.bf16.mxu0 %v708_v1  ;;  %v226_v4 = vld [vmem:[%s800_s30] sm:$0xff]  ;;  %v227_v5 = vld [vmem:[%s800_s30 + $0x8] sm:$0xff]  ;;  %678 = vmatpush3.bf16.msra.mxu1 %v715_v7  ;;  %v719_v14 = vld [vmem:[%s862_s3 + $0x18] sm:$0xff]  }
   0xf   : > { %v230_v6 = vpack.c.bf16 %v227_v5, %v226_v4  ;;  %679 = vmatprep.subr.bf16.mxu1 %v716_v8  ;;  %v718_v12 = vld [vmem:[%s862_s3 + $0x20] sm:$0xff]   ;;  %v713_v13 = vld [vmem:[%s860_s1 + $0x8] sm:$0xff]   ;;  %v228_v16 = vld [vmem:[%s800_s30 + $0x10] sm:$0xff]  ;;  %vm520_vm0 = vcmp.eq.s32.totalorder %v519_v61, 1 }
  0x10   : > { %v714_v15 = vld [vmem:[%s860_s1] sm:$0xff]   ;;  %v229_v17 = vld [vmem:[%s800_s30 + $0x18] sm:$0xff]  ;;  %v720_v19 = vld [vmem:[%s862_s3 + $0x10] sm:$0xff]  }
  0x11   : > { %660 = vmatpush3.bf16.msra.mxu0 %v708_v1  ;;  %673 = vmatprep.mubr.bf16.mxu0 %v230_v6  ;;  %v231_v18 = vpack.c.bf16 %v229_v17, %v228_v16  ;;  %v721_v20 = vld [vmem:[%s862_s3 + $0x8] sm:$0xff]   ;;  %v722_v21 = vld [vmem:[%s862_s3] sm:$0xff]  }
  0x12   : > { %661 = vmatprep.subr.bf16.mxu0 %v709_v2  ;;  %680 = vmatpush3.bf16.msra.mxu1 %v716_v8  ;;  %v617_v24 = vld [vmem:[%s861_s2] ss:$0 sm:$0xff] }
  0x13   : > { %681 = vmatprep.subr.bf16.mxu1 %v717_v10  ;;  %v626_v37 = vld [vmem:[%s863_s4] ss:$0 sm:$0xff] }
  0x15   : > { %662 = vmatpush3.bf16.msra.mxu0 %v709_v2 }
  0x16   : > { %663 = vmatprep.subr.bf16.mxu0 %v710_v3  ;;  %682 = vmatpush3.bf16.msra.mxu1 %v717_v10 }
  0x17   : > { %683 = vmatprep.subr.bf16.mxu1 %v718_v12 }
  0x19   : > { %664 = vmatpush3.bf16.msra.mxu0 %v710_v3 }
  0x1a   : > { %665 = vmatprep.subr.bf16.mxu0 %v711_v9  ;;  %684 = vmatpush3.bf16.msra.mxu1 %v718_v12 }
  0x1b   : > { %685 = vmatprep.subr.bf16.mxu1 %v719_v14 }
  0x1d   : > { %666 = vmatpush3.bf16.msra.mxu0 %v711_v9 }
  0x1e   : > { %667 = vmatprep.subr.bf16.mxu0 %v712_v11  ;;  %686 = vmatpush3.bf16.msra.mxu1 %v719_v14 }
  0x1f   : > { %687 = vmatprep.subr.bf16.mxu1 %v720_v19 }
  0x21   : > { %668 = vmatpush3.bf16.msra.mxu0 %v712_v11 }
  0x22   : > { %669 = vmatprep.subr.bf16.mxu0 %v713_v13  ;;  %688 = vmatpush3.bf16.msra.mxu1 %v720_v19 }
  0x23   : > { %689 = vmatprep.subr.bf16.mxu1 %v721_v20 }
  0x25   : > { %670 = vmatpush3.bf16.msra.mxu0 %v713_v13 }
  0x26   : > { %671 = vmatprep.subr.bf16.mxu0 %v714_v15  ;;  %690 = vmatpush3.bf16.msra.mxu1 %v721_v20 }
  0x27   : > { %691 = vmatprep.subr.bf16.mxu1 %v722_v21 }
  0x29   : > { %672 = vmatpush3.bf16.msra.mxu0 %v714_v15 }
  0x2a   : > { %692 = vmatpush3.bf16.msra.mxu1 %v722_v21 }
  0x2c   : > { %674 = vmatmul.mubr.bf16.vlgmr.msra.gmra.mxu0 %v231_v18 }
  0xec   : > { %v675_v22 = vpop.f32.mrf.mxu0 }
  0xed   : > { %v346_v28 = vadd.f32 %v675_v22, %v617_v24 }
  0xee   : > { %v337_v23 = vpop.f32.mrf.mxu0 }
  0xef   : > { %v338_v26 = vadd.f32 %v617_v24, %v337_v23  ;;  %v354_v34 = vmax.f32 %v346_v28, 0.0 }
  0xf0   : > { %v676_v25 = vpop.f32.mrf.mxu0 }
  0xf1   : > { %v349_v27 = vadd.f32 %v676_v25, %v617_v24  ;;  %v352_v32 = vmax.f32 %v338_v26, 0.0 }
  0xf2   : > { %v340_v29 = vpop.f32.mrf.mxu0 }
  0xf3   : > { %v341_v30 = vadd.f32 %v617_v24, %v340_v29  ;;  %v355_v31 = vmax.f32 %v349_v27, 0.0 }
  0xf5   : > { %v353_v33 = vmax.f32 %v341_v30, 0.0  ;;  %v357_v36 = vpack.c.bf16 %v355_v31, %v354_v34 }
  0xf7   : > { %v356_v35 = vpack.c.bf16 %v353_v33, %v352_v32 }
  0xf9   : > { %693 = vmatprep.mubr.bf16.mxu1 %v356_v35 }
  0xfa   : > { %694 = vmatmul.mubr.bf16.vlgmr.msra.gmra.mxu1 %v357_v36 }
 0x1ba   : > { %v695_v38 = vpop.f32.mrf.mxu1 }
 0x1bb   : > { %v472_v39 = vadd.f32 %v695_v38, %v626_v37 }
 0x1bc   : > { %v463_v40 = vpop.f32.mrf.mxu1 }
 0x1bd   : > { %v464_v41 = vadd.f32 %v626_v37, %v463_v40  ;;  %482 = vmax.xlane.f32.xlu1 %v472_v39  ;;  %v523_v2 = vsel %vm520_vm0, %v472_v39, 0.0 }
 0x1be   : > { %v696_v42 = vpop.f32.mrf.mxu1 }
 0x1bf   : > { %v475_v43 = vadd.f32 %v696_v42, %v626_v37  ;;  %478 = vmax.xlane.f32.xlu0 %v464_v41  ;;  %v521_v0 = vsel %vm520_vm0, %v464_v41, 0.0 }
 0x1c0   : > { %v466_v44 = vpop.f32.mrf.mxu1 }
 0x1c1   : > { %v467_v45 = vadd.f32 %v626_v37, %v466_v44  ;;  %484 = vmax.xlane.f32.xlu1 %v475_v43  ;;  %v524_v3 = vsel %vm520_vm0, %v475_v43, 0.0 }
 0x1c3   : > { %480 = vmax.xlane.f32.xlu0 %v467_v45  ;;  %v522_v1 = vsel %vm520_vm0, %v467_v45, 0.0 }
 0x246   : > { %v483_v46 = vpop.xlane.xlu1 %482 }
 0x247   : > { %v488_v47 = vsub.f32 %v472_v39, %v483_v46 }
 0x248   : > { %v479_v48 = vpop.xlane.xlu0 %478 }
 0x249   : > { %v486_v49 = vsub.f32 %v464_v41, %v479_v48  ;;  %v494_v52 = vmul.f32 1.442695, %v488_v47 }
 0x24a   : > { %v485_v50 = vpop.xlane.xlu1 %484 }
 0x24b   : > { %v490_v51 = vmul.f32 1.442695, %v486_v49  ;;  %v489_v54 = vsub.f32 %v475_v43, %v485_v50 }
 0x24c   : > { %v481_v53 = vpop.xlane.xlu0 %480 }
 0x24d   : > { %723 = vpow2.f32 %v490_v51  ;;  %v487_v55 = vsub.f32 %v467_v45, %v481_v53  ;;  %v496_v57 = vmul.f32 1.442695, %v489_v54 }
 0x24e   : > { %725 = vpow2.f32 %v494_v52 }
 0x24f   : > { %v492_v56 = vmul.f32 1.442695, %v487_v55 }
 0x251   : > { %727 = vpow2.f32 %v492_v56 }
 0x252   : > { %729 = vpow2.f32 %v496_v57 }
 0x25a   : > { %v724_v59 = vpop.eup %723 }
 0x25b   : > { %498 = vadd.xlane.f32.xlu0 %v724_v59  ;;  %v726_v60 = vpop.eup %725 }
 0x25e   : > { %v728_v62 = vpop.eup %727 }
 0x25f   : > { %502 = vadd.xlane.f32.xlu0 %v726_v60  ;;  %500 = vadd.xlane.f32.xlu1 %v728_v62  ;;  %v730_v63 = vpop.eup %729 }
 0x263   : > { %504 = vadd.xlane.f32.xlu1 %v730_v63  ;;  %525 = vadd.xlane.f32.xlu0 %v521_v0 }
 0x267   : > { %527 = vadd.xlane.f32.xlu1 %v522_v1  ;;  %529 = vadd.xlane.f32.xlu0 %v523_v2 }
 0x26b   : > { %531 = vadd.xlane.f32.xlu1 %v524_v3 }
 0x2e4   : > { %v499_v4 = vpop.xlane.xlu0 %498 }
 0x2e5   : > { %731 = vlog2.f32 %v499_v4 }
 0x2e8   : > { %v501_v5 = vpop.xlane.xlu1 %500  ;;  %v503_v6 = vpop.xlane.xlu0 %502 }
 0x2e9   : > { %733 = vlog2.f32 %v501_v5 }
 0x2ea   : > { %735 = vlog2.f32 %v503_v6 }
 0x2ec   : > { %v505_v7 = vpop.xlane.xlu1 %504  ;;  %v526_v11 = vpop.xlane.xlu0 %525 }
 0x2ed   : > { %737 = vlog2.f32 %v505_v7 }
 0x2f0   : > { %v528_v16 = vpop.xlane.xlu1 %527  ;;  %v530_v23 = vpop.xlane.xlu0 %529 }
 0x2f2   : > { %v732_v8 = vpop.eup %731 }
 0x2f3   : > { %v507_v9 = vmul.f32 0.6931472, %v732_v8 }
 0x2f4   : > { %v532_v29 = vpop.xlane.xlu1 %531 }
 0x2f5   : > { %v514_v10 = vadd.f32 %v507_v9, %v479_v48 }
 0x2f6   : > { %v734_v12 = vpop.eup %733 }
 0x2f7   : > { %v736_v13 = vpop.eup %735  ;;  %v509_v14 = vmul.f32 0.6931472, %v734_v12  ;;  %v533_v17 = vsub.f32 %v514_v10, %v526_v11 }
 0x2f8   : > { %v511_v15 = vmul.f32 0.6931472, %v736_v13 }
 0x2f9   : > { %v515_v18 = vadd.f32 %v509_v14, %v481_v53  ;;  %v538_v25 = vsel %vm537_vm1, %v533_v17, 0.0 }
 0x2fa   : > { %v738_v19 = vpop.eup %737  ;;  %v516_v20 = vadd.f32 %v511_v15, %v483_v46 }
 0x2fb   : > { %v513_v21 = vmul.f32 0.6931472, %v738_v19  ;;  %v534_v22 = vsub.f32 %v515_v18, %v528_v16 }
 0x2fc   : > { %v535_v24 = vsub.f32 %v516_v20, %v530_v23 }
 0x2fd   : > { %v539_v26 = vsel %vm537_vm1, %v534_v22, 0.0  ;;  %v517_v27 = vadd.f32 %v513_v21, %v485_v50 }
 0x2fe   : > { %v540_v28 = vadd.f32 %v539_v26, %v538_v25  ;;  %v541_v30 = vsel %vm537_vm1, %v535_v24, 0.0 }
 0x2ff   : > { %v536_v31 = vsub.f32 %v517_v27, %v532_v29 }
 0x300   : > { %v542_v32 = vadd.f32 %v541_v30, %v540_v28 }
 0x301   : > { %v543_v33 = vsel %vm537_vm1, %v536_v31, 0.0 }
 0x302   : > { %v544_v34 = vadd.f32 %v543_v33, %v542_v32 }
 0x304   : > { %545 = vadd.xlane.f32.xlu0 %v544_v34 }
 0x38d   : > { %v546_v35 = vpop.xlane.xlu0 %545 }
 0x38e   : > { %v547_v36 = vrot.slane %v546_v35, 4 }
 0x390   : > { %v548_v37 = vadd.f32 %v547_v36, %v546_v35 }
 0x392   : > { %v549_v38 = vrot.slane %v548_v37, 2 }
 0x394   : > { %v550_v39 = vadd.f32 %v549_v38, %v548_v37 }
 0x396   : > { %v551_v40 = vrot.slane %v550_v39, 1 }
 0x398   : > { %v552_v41 = vadd.f32 %v551_v40, %v550_v39 }
 0x39a   : > { %697 = vpush %v552_v41 }
 0x3cb   : > { %s698_s17 = spop %697 }
 0x3cc   : > { %v554_v42 = vstv %s698_s17 }
 0x3cd   : > { %555 = vst [vmem:[%s224_s16] sm:$0xff] %v554_v42 }
 0x3ce PF: > { %s15_s18 = sadd.s32 1, %s745_s18  }
 0x3cf   : > { %p12_p5 = scmp.ge.s32.totalorder %s15_s18, 4  }
 0x3d1   :  { %14 = sbr.rel (!%p12_p5) target bundleno = 1 (0x1), region = 70 }

</bundles_post_ra>
